<compile_context>
chip_gen: v6e
topology: v6e:2x2x1
jax: 0.10.0
libtpu: 0.0.40
codegen_flags: <defaults>
</compile_context>

<pallas_src>
import functools

import numpy as np
import jax
import jax.numpy as jnp
from jax.experimental import pallas as pl
from jax.experimental.pallas import tpu as pltpu


def _round_up(x, m):
    return (x + m - 1) // m * m


@functools.lru_cache(maxsize=1)
def _is_v5():
    # v5 parts: 128x128 MXUs and a ~16 MiB scoped-VMEM default -> smaller tiles.
    try:
        kind = jax.devices()[0].device_kind.lower()
    except Exception:  # pragma: no cover
        kind = ""
    return "v5" in kind


def _tile_m():
    return 128 if _is_v5() else 256


def _conv_cout_tile():
    # Per-accumulator Cout tile for the 3x3 conv: keeps the fp32 accumulator bounded and
    # feeds the full MXU width (128 on v5e's 128-wide MXU, 256 on v6e/v7x's 256-wide MXU).
    return 128 if _is_v5() else 256


# Explicit scoped-VMEM cap: well under v7x's 64 MiB physical VMEM, above v5e's 16 MiB
# scoped default (v5e physical is 128 MiB).  Actual per-call usage stays <= ~14 MiB.
_VMEM_LIMIT = 28 * 1024 * 1024


# ----------------------------- Pallas kernels -----------------------------

def _mm_bn_act_kernel(x_ref, w_ref, s_ref, b_ref, *rest, relu, has_res):
    """K-tiled matmul, fp32 VMEM accumulator; epilogue = BN affine
    (+ optional residual add) (+ optional ReLU) in fp32, stored bf16."""
    if has_res:
        res_ref, o_ref, acc_ref = rest
    else:
        o_ref, acc_ref = rest
    k = pl.program_id(2)

    @pl.when(k == 0)
    def _():
        acc_ref[...] = jnp.zeros_like(acc_ref)

    acc_ref[...] += jnp.dot(x_ref[...], w_ref[...],
                            preferred_element_type=jnp.float32)

    @pl.when(k == pl.num_programs(2) - 1)
    def _():
        out = acc_ref[...] * s_ref[...] + b_ref[...]
        if has_res:
            out = out + res_ref[...].astype(jnp.float32)
        if relu:
            out = jnp.maximum(out, 0.0)
        o_ref[...] = out.astype(o_ref.dtype)


def _slab_fetch(xg_hbm, slab, sem, tm, slab_rows, n_par, mg_pad, m, base, nm_inner):
    """Manual double-buffered halo-slab DMA: prefetch tile m+1 while computing tile m.
    `m` is the innermost (sequential, "arbitrary") grid index; `base` offsets it into the
    global M-tile range (outer parallel M-half axis).  mg_pad/tm are multiples of 8 so
    every DMA start offset is sublane-aligned."""

    def src(g, p):
        start = pl.multiple_of(p * mg_pad + g * tm, 8)
        return xg_hbm.at[pl.ds(start, slab_rows)]

    def issue(g, buf):
        for p in range(n_par):
            idx = buf * n_par + p
            pltpu.make_async_copy(src(g, p), slab.at[idx], sem.at[idx]).start()

    @pl.when(m == 0)
    def _():
        issue(base, 0)

    @pl.when(m + 1 < nm_inner)
    def _():
        issue(base + m + 1, (m + 1) % 2)

    buf = m % 2
    for p in range(n_par):
        idx = buf * n_par + p
        # Rebuild the exact descriptor that was started (same source slice / byte count).
        pltpu.make_async_copy(src(base + m, p), slab.at[idx], sem.at[idx]).wait()
    return buf


def _conv_tap_kernel(xg_hbm, w_ref, s_ref, b_ref, o_ref, slab, sem, acc_ref,
                     *, taps, tm, slab_rows, n_par, mg_pad, nm_inner, relu):
    """3x3 conv as 9 shifted 1x1 matmuls; fp32 accumulation in a bounded (tm, TCO)
    VMEM scratch so the chain never spills the vreg file.  No im2col in HBM."""
    m = pl.program_id(2)
    base = pl.program_id(0) * nm_inner
    buf = _slab_fetch(xg_hbm, slab, sem, tm, slab_rows, n_par, mg_pad,
                      m=m, base=base, nm_inner=nm_inner)

    def tap(t):
        p, off = taps[t]
        return jnp.dot(slab.at[buf * n_par + p][off:off + tm, :], w_ref[t],
                       preferred_element_type=jnp.float32)

    acc_ref[...] = tap(0)
    for t in range(1, len(taps)):
        acc_ref[...] += tap(t)

    out = acc_ref[...] * s_ref[...] + b_ref[...]
    if relu:
        out = jnp.maximum(out, 0.0)
    o_ref[...] = out.astype(o_ref.dtype)


def _pool_tap_kernel(xg_hbm, o_ref, slab, sem,
                     *, taps, tm, slab_rows, n_par, mg_pad, nm_inner):
    """3x3/2 max-pool as a shifted-tap max over the halo slab, reduced in the input
    dtype (bf16) -- no fp32 round trip."""
    m = pl.program_id(1)
    base = pl.program_id(0) * nm_inner
    buf = _slab_fetch(xg_hbm, slab, sem, tm, slab_rows, n_par, mg_pad,
                      m=m, base=base, nm_inner=nm_inner)
    p0, off0 = taps[0]
    acc = slab.at[buf * n_par + p0][off0:off0 + tm, :]
    for (p, off) in taps[1:]:
        acc = jnp.maximum(acc, slab.at[buf * n_par + p][off:off + tm, :])
    o_ref[...] = acc


def _gap_fc_kernel(x_ref, w_ref, b_ref, o_ref):
    """Global average pool fused with the final Linear(2048 -> 7) head, whole batch in
    one matmul (no degenerate per-image M=1 calls)."""
    x = x_ref[...].astype(jnp.float32)                 # [N, HW, C]
    pooled = jnp.mean(x, axis=1)                       # [N, C]
    o_ref[...] = jnp.dot(pooled, w_ref[...],
                         preferred_element_type=jnp.float32) + b_ref[...]


# ----------------------------- Pallas wrappers -----------------------------

def _matmul_core(x, w, scale, shift, residual, relu):
    """[M,K]@[K,N] * scale[N] + shift[N] (+ residual) (+ ReLU), bf16 in / bf16 out."""
    M, K = x.shape
    Kw, N = w.shape
    assert K == Kw
    if _is_v5():
        TM, tk_cap, tn_cap = 128, 512, 512          # fits v5e's 16 MiB scoped default
    else:
        TM, tk_cap, tn_cap = 256, 2048, 1024        # ~13 MiB worst case (v7x-safe)
    TM = min(TM, _round_up(M, 8))
    TK = K if K <= tk_cap else tk_cap
    TN = N if N <= tn_cap else tn_cap
    assert K % TK == 0 and N % TN == 0
    Mp = _round_up(M, TM)
    if Mp != M:
        x = jnp.pad(x, ((0, Mp - M), (0, 0)))
        if residual is not None:
            residual = jnp.pad(residual, ((0, Mp - M), (0, 0)))
    nm, nn, nk = Mp // TM, N // TN, K // TK
    has_res = residual is not None

    in_specs = [
        pl.BlockSpec((TM, TK), lambda m, n, k: (m, k)),
        pl.BlockSpec((TK, TN), lambda m, n, k: (k, n)),
        pl.BlockSpec((1, TN), lambda m, n, k: (0, n)),
        pl.BlockSpec((1, TN), lambda m, n, k: (0, n)),
    ]
    args = [x, w, scale, shift]
    if has_res:
        in_specs.append(pl.BlockSpec((TM, TN), lambda m, n, k: (m, n)))
        args.append(residual)

    out = pl.pallas_call(
        functools.partial(_mm_bn_act_kernel, relu=relu, has_res=has_res),
        out_shape=jax.ShapeDtypeStruct((Mp, N), jnp.bfloat16),
        grid=(nm, nn, nk),
        in_specs=in_specs,
        out_specs=pl.BlockSpec((TM, TN), lambda m, n, k: (m, n)),
        scratch_shapes=[pltpu.VMEM((TM, TN), jnp.float32)],
        compiler_params=pltpu.CompilerParams(
            dimension_semantics=("parallel", "parallel", "arbitrary"),
            vmem_limit_bytes=_VMEM_LIMIT),
    )(*args)
    return out[:M] if Mp != M else out


def _parity_grids(x, k, stride, pad, pad_value):
    """Stride-grouped, spatially padded views of x, flattened per parity grid so that
    conv tap (di, dj) is a uniform row shift of (di//s)*Wg + (dj//s) within grid
    (di%s, dj%s).  Total size ~= 1x the input (a layout copy, not a 9x im2col)."""
    # TODO(synk): for stride=1 this is just a pad-copy; fusing it (and the post-kernel
    #             crop) into the neighbouring 1x1 convs would remove ~2 HBM passes/block.
    N, H, W, C = x.shape
    OH = (H + 2 * pad - k) // stride + 1
    OW = (W + 2 * pad - k) // stride + 1
    amax = (k - 1) // stride
    Hg, Wg = OH + amax, OW + amax
    hneed, wneed = stride * Hg, stride * Wg
    xpad = jnp.pad(x, ((0, 0), (pad, hneed - H - pad), (pad, wneed - W - pad), (0, 0)),
                   constant_values=pad_value)
    grids = [xpad[:, p::stride, q::stride, :][:, :Hg, :Wg, :]
             for p in range(stride) for q in range(stride)]
    xg = jnp.stack(grids, axis=0).reshape(stride * stride, N * Hg * Wg, C)
    return xg, OH, OW, Hg, Wg


@functools.partial(jax.jit, static_argnames=("stride",))
def conv3x3_bn(x, w9, scale, shift, *, stride):
    """3x3 conv (pad 1) + folded BN + ReLU via shifted-tap accumulation.

    Grid = (M-half "parallel", Cout tile, M tile): the parallel outer axis lets v7x's two
    TensorCores split the work; Cout tiling bounds the fp32 accumulator; the inner M axis
    stays sequential for the manual double-buffered halo-slab DMA."""
    N, H, W, Cin = x.shape
    Cout = w9.shape[-1]
    xg, OH, OW, Hg, Wg = _parity_grids(x, 3, stride, 1, 0.0)
    n_par = stride * stride
    Mg = N * Hg * Wg
    tm = min(_tile_m(), _round_up(Mg, 8))
    TCO = min(_conv_cout_tile(), Cout)
    assert Cout % TCO == 0
    nco = Cout // TCO
    nm_total = pl.cdiv(Mg, tm)
    nsplit = 2 if nm_total >= 2 else 1
    nm_total = _round_up(nm_total, nsplit)
    nm_inner = nm_total // nsplit
    amax = (3 - 1) // stride
    halo = _round_up(amax * Wg + amax, 8)          # 8-aligned -> aligned DMA offsets
    slab_rows = tm + halo
    mg_pad = nm_total * tm + halo
    xg = jnp.pad(xg, ((0, 0), (0, mg_pad - Mg), (0, 0))).reshape(n_par * mg_pad, Cin)
    taps = tuple(((di % stride) * stride + (dj % stride),
                  (di // stride) * Wg + (dj // stride))
                 for di in range(3) for dj in range(3))

    out = pl.pallas_call(
        functools.partial(_conv_tap_kernel, taps=taps, tm=tm, slab_rows=slab_rows,
                          n_par=n_par, mg_pad=mg_pad, nm_inner=nm_inner, relu=True),
        out_shape=jax.ShapeDtypeStruct((nm_total * tm, Cout), jnp.bfloat16),
        grid=(nsplit, nco, nm_inner),
        in_specs=[
            pl.BlockSpec(memory_space=pl.ANY),                       # activations in HBM
            pl.BlockSpec((9, Cin, TCO), lambda h, co, m: (0, 0, co)),
            pl.BlockSpec((1, TCO), lambda h, co, m: (0, co)),
            pl.BlockSpec((1, TCO), lambda h, co, m: (0, co)),
        ],
        out_specs=pl.BlockSpec((tm, TCO), lambda h, co, m: (h * nm_inner + m, co)),
        scratch_shapes=[
            pltpu.VMEM((2 * n_par, slab_rows, Cin), jnp.bfloat16),   # halo slab x2 bufs
            pltpu.SemaphoreType.DMA((2 * n_par,)),
            pltpu.VMEM((tm, TCO), jnp.float32),                      # bounded accumulator
        ],
        compiler_params=pltpu.CompilerParams(
            dimension_semantics=("parallel", "arbitrary", "arbitrary"),
            vmem_limit_bytes=_VMEM_LIMIT),
    )(xg, w9, scale, shift)
    return out[:Mg].reshape(N, Hg, Wg, Cout)[:, :OH, :OW, :]


@jax.jit
def maxpool3x3(x):
    """NHWC max-pool, kernel 3, stride 2, pad 1 (PyTorch semantics: -inf padding).
    Outer M-half axis is 'parallel' so v7x megacore can split it."""
    N, H, W, C = x.shape
    xg, OH, OW, Hg, Wg = _parity_grids(x, 3, 2, 1, -jnp.inf)
    n_par = 4
    Mg = N * Hg * Wg
    tm = min(_tile_m(), _round_up(Mg, 8))
    nm_total = pl.cdiv(Mg, tm)
    nsplit = 2 if nm_total >= 2 else 1
    nm_total = _round_up(nm_total, nsplit)
    nm_inner = nm_total // nsplit
    halo = _round_up(Wg + 1, 8)
    slab_rows = tm + halo
    mg_pad = nm_total * tm + halo
    xg = jnp.pad(xg, ((0, 0), (0, mg_pad - Mg), (0, 0))).reshape(n_par * mg_pad, C)
    taps = tuple(((di % 2) * 2 + (dj % 2), (di // 2) * Wg + (dj // 2))
                 for di in range(3) for dj in range(3))

    out = pl.pallas_call(
        functools.partial(_pool_tap_kernel, taps=taps, tm=tm, slab_rows=slab_rows,
                          n_par=n_par, mg_pad=mg_pad, nm_inner=nm_inner),
        out_shape=jax.ShapeDtypeStruct((nm_total * tm, C), x.dtype),
        grid=(nsplit, nm_inner),
        in_specs=[pl.BlockSpec(memory_space=pl.ANY)],
        out_specs=pl.BlockSpec((tm, C), lambda h, m: (h * nm_inner + m, 0)),
        scratch_shapes=[
            pltpu.VMEM((2 * n_par, slab_rows, C), x.dtype),
            pltpu.SemaphoreType.DMA((2 * n_par,)),
        ],
        compiler_params=pltpu.CompilerParams(
            dimension_semantics=("parallel", "arbitrary")),
    )(xg)
    return out[:Mg].reshape(N, Hg, Wg, C)[:, :OH, :OW, :]


@functools.partial(jax.jit, static_argnames=("stride", "relu"))
def conv1x1_bn(x, w, scale, shift, residual=None, *, stride=1, relu=True):
    """1x1 conv + folded BN (+ fused residual add) (+ ReLU) as a direct matmul."""
    if stride > 1:
        x = x[:, ::stride, ::stride, :]
    N, H, W, C = x.shape
    res = None if residual is None else residual.reshape(N * H * W, -1)
    out = _matmul_core(x.reshape(N * H * W, C), w, scale, shift, res, relu)
    return out.reshape(N, H, W, -1)


def _im2col(x, kh, kw, stride, pad):
    N, H, W, C = x.shape
    OH = (H + 2 * pad - kh) // stride + 1
    OW = (W + 2 * pad - kw) // stride + 1
    xp = jnp.pad(x, ((0, 0), (pad, pad), (pad, pad), (0, 0)))
    taps = []
    for i in range(kh):
        for j in range(kw):
            taps.append(xp[:, i:i + stride * OH:stride, j:j + stride * OW:stride, :])
    patches = jnp.stack(taps, axis=3)                      # [N, OH, OW, KH*KW, C]
    return patches.reshape(N * OH * OW, kh * kw * C), OH, OW


@jax.jit
def stem_conv(x_nchw, w, scale, shift):
    """7x7/2 stem conv + folded BN + ReLU (NCHW input, bf16 NHWC output).
    Cout is lane-padded to 128 at parameter level for lane-dense stores."""
    x = jnp.transpose(x_nchw, (0, 2, 3, 1)).astype(jnp.bfloat16)
    N = x.shape[0]
    # TODO(synk): the 7x7/2 stem still materializes im2col patches (single 3-channel layer).
    patches, OH, OW = _im2col(x, 7, 7, 2, 3)
    patches = jnp.pad(patches, ((0, 0), (0, w.shape[0] - patches.shape[1])))
    out = _matmul_core(patches, w, scale, shift, None, True)
    return out.reshape(N, OH, OW, -1)


@jax.jit
def gap_fc(x, w, b):
    """Fused global average pool + Linear(2048 -> 7) head in a single pallas_call
    (output lane-padded to 128)."""
    N, H, W, C = x.shape
    x3 = x.reshape(N, H * W, C)
    NOUTp = w.shape[1]
    out = pl.pallas_call(
        _gap_fc_kernel,
        out_shape=jax.ShapeDtypeStruct((N, NOUTp), jnp.float32),
        grid=(1,),
        in_specs=[
            pl.BlockSpec((N, H * W, C), lambda i: (0, 0, 0)),
            pl.BlockSpec((C, NOUTp), lambda i: (0, 0)),
            pl.BlockSpec((1, NOUTp), lambda i: (0, 0)),
        ],
        out_specs=pl.BlockSpec((N, NOUTp), lambda i: (0, 0)),
        compiler_params=pltpu.CompilerParams(dimension_semantics=("arbitrary",)),
    )(x3, w, b)
    return out


# ----------------------------- network glue -----------------------------

def bottleneck(x, p, stride):
    out = conv1x1_bn(x, p["conv1"]["w"], p["conv1"]["scale"], p["conv1"]["shift"],
                     relu=True)
    out = conv3x3_bn(out, p["conv2"]["w"], p["conv2"]["scale"], p["conv2"]["shift"],
                     stride=stride)
    if "down" in p:
        sc = conv1x1_bn(x, p["down"]["w"], p["down"]["scale"], p["down"]["shift"],
                        stride=stride, relu=False)
    else:
        sc = x
    # residual add + ReLU fused into the conv3 matmul epilogue
    return conv1x1_bn(out, p["conv3"]["w"], p["conv3"]["scale"], p["conv3"]["shift"],
                      residual=sc, relu=True)


def custom_resnext_forward(params, x_nchw):
    x = stem_conv(x_nchw, params["stem"]["w"], params["stem"]["scale"],
                  params["stem"]["shift"])                       # 7x7/2 + BN + ReLU
    x = maxpool3x3(x)                                            # 3x3/2 max-pool
    for si, stage in enumerate(params["stages"]):
        for bi, blk in enumerate(stage):
            stride = 2 if (si > 0 and bi == 0) else 1
            x = bottleneck(x, blk, stride)
    logits = gap_fc(x, params["fc_w"], params["fc_b"])           # fused GAP + FC
    return logits[:, :7]                                          # [N, 7]


# ----------------------------- parameter init -----------------------------

def _bn_fold(key, cout):
    k2, k3, k4, k5 = jax.random.split(key, 4)
    gamma = jax.random.uniform(k2, (cout,), jnp.float32, 0.8, 1.2)
    beta = jax.random.normal(k3, (cout,), jnp.float32) * 0.05
    mean = jax.random.normal(k4, (cout,), jnp.float32) * 0.05
    var = jax.random.uniform(k5, (cout,), jnp.float32, 0.8, 1.2)
    scale = gamma / jnp.sqrt(var + 1e-5)           # fold BN: y = conv*scale + shift
    shift = beta - mean * scale
    return scale.reshape(1, -1), shift.reshape(1, -1)


def _conv_bn_params(key, kh, kw, cin, cout, cin_pad=None, cout_pad=None):
    """Conv + folded BN params.  Optional zero-padding of cin/cout to lane-friendly sizes:
    padded output channels have scale=shift=0, so after the affine (+ReLU) they are exactly
    0 and the network output is unchanged."""
    cin_pad = cin if cin_pad is None else cin_pad
    cout_pad = cout if cout_pad is None else cout_pad
    kw_key, kbn = jax.random.split(key)
    w = jax.random.normal(kw_key, (kh, kw, cin, cout), jnp.float32) * np.sqrt(
        2.0 / (kh * kw * cin))
    scale, shift = _bn_fold(kbn, cout)
    w = jnp.pad(w, ((0, 0), (0, 0), (0, cin_pad - cin), (0, cout_pad - cout)))
    scale = jnp.pad(scale, ((0, 0), (0, cout_pad - cout)))
    shift = jnp.pad(shift, ((0, 0), (0, cout_pad - cout)))
    if kh == 1 and kw == 1:
        w2 = w.reshape(cin_pad, cout_pad)
    elif kh == 3:
        w2 = w.reshape(9, cin_pad, cout_pad)       # tap-major for the 3x3 kernel
    else:                                          # 7x7 stem, im2col layout, K padded
        k_raw = kh * kw * cin_pad
        w2 = jnp.pad(w.reshape(k_raw, cout_pad),
                     ((0, _round_up(k_raw, 8) - k_raw), (0, 0)))
    return dict(w=w2.astype(jnp.bfloat16), scale=scale, shift=shift)


def init_params(seed=0):
    key = jax.random.PRNGKey(seed)
    keys = iter(jax.random.split(key, 256))
    # Stem Cout (64) lane-padded to 128 so the pool and stage-1 activations are 128-wide.
    params = {"stem": _conv_bn_params(next(keys), 7, 7, 3, 64, cout_pad=128)}
    cin, cin_p = 64, 128
    stages = []
    # resnet50 bottleneck stages: (blocks, width, out_channels)
    for (nblocks, width, cout) in [(3, 64, 256), (4, 128, 512),
                                   (6, 256, 1024), (3, 512, 2048)]:
        width_p = max(width, 128)                  # lane-pad the 64-wide stage-1 layers
        stage = []
        for b in range(nblocks):
            p = {
                "conv1": _conv_bn_params(next(keys), 1, 1, cin, width,
                                         cin_pad=cin_p, cout_pad=width_p),
                "conv2": _conv_bn_params(next(keys), 3, 3, width, width,
                                         cin_pad=width_p, cout_pad=width_p),
                "conv3": _conv_bn_params(next(keys), 1, 1, width, cout,
                                         cin_pad=width_p),
            }
            if b == 0:
                p["down"] = _conv_bn_params(next(keys), 1, 1, cin, cout, cin_pad=cin_p)
            stage.append(p)
            cin, cin_p = cout, cout
        stages.append(stage)
    params["stages"] = stages
    fc_w = jax.random.normal(next(keys), (2048, 7), jnp.float32) / np.sqrt(2048)
    fc_b = jax.random.normal(next(keys), (7,), jnp.float32) * 0.01
    params["fc_w"] = jnp.pad(fc_w, ((0, 0), (0, 128 - 7)))       # lane-pad the tiny head
    params["fc_b"] = jnp.pad(fc_b, ((0, 128 - 7),)).reshape(1, 128)
    return params


if __name__ == "__main__":
    key = jax.random.PRNGKey(0)
    x = jax.random.normal(key, (2, 3, 64, 64), jnp.float32)      # NCHW, small image
    params = init_params(seed=0)
    out = custom_resnext_forward(params, x)
    out = jax.block_until_ready(out)
    assert out.shape == (2, 7), out.shape
    assert bool(jnp.all(jnp.isfinite(out)))
    print("KERNEL_OK")
</pallas_src>

<mosaic_0001>
module attributes {stable_mosaic.version = 11 : i64} {
  func.func @_mm_bn_act_kernel(%arg0: i32, %arg1: i32, %arg2: i32, %arg3: memref<256x152xbf16, #tpu.memory_space<vmem>>, %arg4: memref<152x128xbf16, #tpu.memory_space<vmem>>, %arg5: memref<1x128xf32, #tpu.memory_space<vmem>>, %arg6: memref<1x128xf32, #tpu.memory_space<vmem>>, %arg7: memref<256x128xbf16, #tpu.memory_space<vmem>>, %arg8: memref<256x128xf32, #tpu.memory_space<vmem>>) attributes {dimension_semantics = [#tpu.dimension_semantics<parallel>, #tpu.dimension_semantics<parallel>, #tpu.dimension_semantics<arbitrary>], iteration_bounds = array<i64: 8, 1, 1>, scalar_prefetch = 0 : i64, scratch_operands = 1 : i64, tpu.core_type = #tpu.core_type<tc>, window_params = [{transform_indices = @transform_0, window_bounds = array<i64: 256, 152>}, {transform_indices = @transform_1, window_bounds = array<i64: 152, 128>}, {transform_indices = @transform_2, window_bounds = array<i64: 1, 128>}, {transform_indices = @transform_3, window_bounds = array<i64: 1, 128>}, {transform_indices = @transform_4, window_bounds = array<i64: 256, 128>}]} {
    %c0_i32 = arith.constant 0 : i32
    %0 = arith.cmpi eq, %arg2, %c0_i32 : i32
    %1 = arith.extui %0 : i1 to i32
    %c0_i32_0 = arith.constant 0 : i32
    %2 = arith.cmpi ne, %1, %c0_i32_0 : i32
    scf.if %2 {
      %cst_10 = arith.constant 0.000000e+00 : f32
      %12 = vector.broadcast %cst_10 : f32 to vector<256x128xf32>
      %c0_11 = arith.constant 0 : index
      %c0_12 = arith.constant 0 : index
      %13 = vector.load %arg8[%c0_11, %c0_12] : memref<256x128xf32, #tpu.memory_space<vmem>>, vector<256x128xf32>
      tpu.vector_store %arg8[%c0_11, %c0_12], %12 {strides = array<i32>} : memref<256x128xf32, #tpu.memory_space<vmem>>, vector<256x128xf32>,
    } else {
    }
    %c0 = arith.constant 0 : index
    %c0_1 = arith.constant 0 : index
    %3 = vector.load %arg8[%c0, %c0_1] : memref<256x128xf32, #tpu.memory_space<vmem>>, vector<256x128xf32>
    %c0_2 = arith.constant 0 : index
    %c0_3 = arith.constant 0 : index
    %4 = vector.load %arg3[%c0_2, %c0_3] : memref<256x152xbf16, #tpu.memory_space<vmem>>, vector<256x152xbf16>
    %c0_4 = arith.constant 0 : index
    %c0_5 = arith.constant 0 : index
    %5 = vector.load %arg4[%c0_4, %c0_5] : memref<152x128xbf16, #tpu.memory_space<vmem>>, vector<152x128xbf16>
    %cst = arith.constant dense<0.000000e+00> : vector<256x128xf32>
    %6 = tpu.matmul %4, %5, %cst {dimension_numbers = #tpu.dot_dimension_numbers<[1], [0], [0], [1], [0, 0, 1, 1], [], []>} : vector<256x152xbf16>, vector<152x128xbf16>, vector<256x128xf32> -> vector<256x128xf32>
    %7 = arith.addf %3, %6 : vector<256x128xf32>
    %c0_6 = arith.constant 0 : index
    %c0_7 = arith.constant 0 : index
    %8 = vector.load %arg8[%c0_6, %c0_7] : memref<256x128xf32, #tpu.memory_space<vmem>>, vector<256x128xf32>
    tpu.vector_store %arg8[%c0_6, %c0_7], %7 {strides = array<i32>} : memref<256x128xf32, #tpu.memory_space<vmem>>, vector<256x128xf32>,
    %c0_i32_8 = arith.constant 0 : i32
    %9 = arith.cmpi eq, %arg2, %c0_i32_8 : i32
    %10 = arith.extui %9 : i1 to i32
    %c0_i32_9 = arith.constant 0 : i32
    %11 = arith.cmpi ne, %10, %c0_i32_9 : i32
    scf.if %11 {
      %c0_10 = arith.constant 0 : index
      %c0_11 = arith.constant 0 : index
      %12 = vector.load %arg8[%c0_10, %c0_11] : memref<256x128xf32, #tpu.memory_space<vmem>>, vector<256x128xf32>
      %c0_12 = arith.constant 0 : index
      %c0_13 = arith.constant 0 : index
      %13 = vector.load %arg5[%c0_12, %c0_13] : memref<1x128xf32, #tpu.memory_space<vmem>>, vector<1x128xf32>
      %14 = vector.broadcast %13 : vector<1x128xf32> to vector<256x128xf32>
      %15 = arith.mulf %12, %14 : vector<256x128xf32>
      %c0_14 = arith.constant 0 : index
      %c0_15 = arith.constant 0 : index
      %16 = vector.load %arg6[%c0_14, %c0_15] : memref<1x128xf32, #tpu.memory_space<vmem>>, vector<1x128xf32>
      %17 = vector.broadcast %16 : vector<1x128xf32> to vector<256x128xf32>
      %18 = arith.addf %15, %17 : vector<256x128xf32>
      %cst_16 = arith.constant 0.000000e+00 : f32
      %19 = vector.broadcast %cst_16 : f32 to vector<256x128xf32>
      %20 = arith.maximumf %18, %19 : vector<256x128xf32>
      %21 = arith.truncf %20 : vector<256x128xf32> to vector<256x128xbf16>
      %c0_17 = arith.constant 0 : index
      %c0_18 = arith.constant 0 : index
      %22 = vector.load %arg7[%c0_17, %c0_18] : memref<256x128xbf16, #tpu.memory_space<vmem>>, vector<256x128xbf16>
      tpu.vector_store %arg7[%c0_17, %c0_18], %21 {strides = array<i32>} : memref<256x128xbf16, #tpu.memory_space<vmem>>, vector<256x128xbf16>,
    } else {
    }
    return
  }
  func.func @transform_0(%arg0: i32, %arg1: i32, %arg2: i32) -> (i32, i32) {
    %c0_i32 = arith.constant 0 : i32
    return %arg0, %arg2 : i32, i32
  }
  func.func @transform_1(%arg0: i32, %arg1: i32, %arg2: i32) -> (i32, i32) {
    %c0_i32 = arith.constant 0 : i32
    return %arg2, %arg1 : i32, i32
  }
  func.func @transform_2(%arg0: i32, %arg1: i32, %arg2: i32) -> (i32, i32) {
    %c0_i32 = arith.constant 0 : i32
    %c0_i32_0 = arith.constant 0 : i32
    return %c0_i32, %arg1 : i32, i32
  }
  func.func @transform_3(%arg0: i32, %arg1: i32, %arg2: i32) -> (i32, i32) {
    %c0_i32 = arith.constant 0 : i32
    %c0_i32_0 = arith.constant 0 : i32
    return %c0_i32, %arg1 : i32, i32
  }
  func.func @transform_4(%arg0: i32, %arg1: i32, %arg2: i32) -> (i32, i32) {
    %c0_i32 = arith.constant 0 : i32
    return %arg0, %arg1 : i32, i32
  }
}

</mosaic_0001>

<bundles_post_ra>
// kernel: stem_conv.1
= control target key start
LH: loop header
LB: loop body
LE: loop exit
PB: predicated region body
PF: predicated region fallthrough
CT: control target
= control target key end

     0   :  { %9 = vsyncpa [#allocation4], 0  ;;  %s2113_s0 = inlined_call_operand.vmem [shape: bf16[2048,152], index: 0, kind: input, shape index: {}]   ;;  %s2114_s1 = inlined_call_operand.vmem [shape: bf16[152,128], index: 1, kind: input, shape index: {}]   ;;  %s2115_s2 = inlined_call_operand.vmem [shape: f32[1,128], index: 2, kind: input, shape index: {}]   ;;  %s2116_s3 = inlined_call_operand.vmem [shape: f32[1,128], index: 3, kind: input, shape index: {}]   ;;  %s2117_s4 = inlined_call_operand.hbm [shape: bf16[2048,128], index: 4, kind: output, shape index: {}]  }
   0x1   :  { %11 = vsyncpa [#allocation4 + $0x1], 0  ;;  %s1823_s15 = smov 0   ;;  %s1825_s16 = smov 0  }
   0x2   :  { %s1827_s17 = smov 0   ;;  %s1829_s18 = smov 0  }
   0x3   :  { %s1831_s19 = smov 0   ;;  %s1833_s20 = smov 0  }
   0x4 LB: > { %s1342_s21 = sadd.s32 4294967295, %s1792_s20   ;;  %s1343_s22 = sadd.s32 4294967294, %s1792_s20   ;;  %s1792_s20 = sphi %s1833_s20, %s17_s20   ;;  %s1788_s19 = sphi %s1831_s19, %s2124_s19   ;;  %s1784_s18 = sphi %s1829_s18, %s2123_s18   ;;  %s1780_s17 = sphi %s1827_s17, %s2122_s17   ;;  %s1776_s16 = sphi %s1825_s16, %s2121_s16   ;;  %s1772_s15 = sphi %s1823_s15, %s2120_s15  }
   0x5   : > { %s36_s23 = sadd.s32 1, %s1788_s19  ;;  %s153_s24 = sadd.s32 1, %s1780_s17 }
   0x6   : > { %p38_p0 = scmp.ge.s32.totalorder %s36_s23, 8  ;;  %p163_p1 = scmp.ne.s32.totalorder %s1780_s17, %s1776_s16 }
   0x7   : > { %p164_p2 = scmp.eq.s32.totalorder %s1342_s21, 7  ;;  %p169_p3 = scmp.ne.s32.totalorder %s1776_s16, %s1772_s15 }
   0x8   : > { %s2126_s23 = smov (%p38_p0, %s36_s23), 0  ;;  %p170_p5 = scmp.eq.s32.totalorder %s1343_s22, 7 }
   0x9   : > { %p1863_p4 = por %p164_p2, %p163_p1  ;;  %s148_s26 = ssub.s32 %s1788_s19, %s2126_s23 }
   0xa   : > { %p1349_p6 = scmp.ge.s32.totalorder %s1792_s20, 1  ;;  %p151_p7 = scmp.eq.s32.totalorder %s148_s26, 0 }
   0xb   : > { %p1870_p8 = por %p170_p5, %p169_p3  ;;  %p227_p9 = scmp.lt.s32.totalorder %s1792_s20, 9 }
   0xc   : > { %s1876_s28 = scalar_select %p151_p7, %s1780_s17, %s153_s24  }
   0xd   : > { %p228_p10 = pnand %p1349_p6, %p227_p9 }
   0xe   : > { %s1351_s7 = sshll.u32 (!%p228_p10), %s1784_s18, 5  ;;  %s1484_s29 = sshll.u32 (!%p228_p10), %s1784_s18, 11 }
   0xf   : > { %231 = sbr.rel (%p228_p10) target bundleno = 336 (0x150), region = 36  ;;  %p274_p11 = scmp.lt.s32.totalorder (!%p228_p10), %s1351_s7, 255 }
  0x10   : > { %s1795_s9 = smov (!%p228_p10), [#allocation3]  }
  0x14   : > { %v1658_v0 = vld [vmem:[%s2114_s1 + $0x38] sm:$0xff]   ;;  %v1794_v1 = vmov 0   ;;  %v1659_v2 = vld [vmem:[%s2114_s1 + $0x30] sm:$0xff]   ;;  %s2128_s7 = smov (!%p274_p11, %s1351_s7), 255  ;;  %v1660_v3 = vld [vmem:[%s2114_s1 + $0x28] sm:$0xff]   ;;  %vm621_vm0 = vcmask 195584  }
  0x15   : > { %674 = vmatprep.subr.bf16.mxu0 %v1794_v1  ;;  %1580 = vmatprep.subr.bf16.mxu1 %v1794_v1  ;;  %s1451_s10 = sshll.u32 %s2128_s7, 3  ;;  %v1661_v4 = vld [vmem:[%s2114_s1 + $0x20] sm:$0xff]   ;;  %v1662_v7 = vld [vmem:[%s2114_s1 + $0x18] sm:$0xff]   ;;  %v1663_v8 = vld [vmem:[%s2114_s1 + $0x10] sm:$0xff]   ;;  %vm670_vm1 = vcmask 1043456   ;;  %s2060_s7 = scalar_lea.hbm %s2117_s4, %s1484_s29 }
  0x16   : > { %675 = vmatpush1.bf16.msra.mxu0 %v1658_v0  ;;  %1590 = vmatpush1.bf16.msra.mxu1 %v1658_v0  ;;  %s1891_s13 = scalar_lea.vmem %s2113_s0, %s1451_s10  ;;  %v1664_v9 = vld [vmem:[%s2114_s1 + $0x8] sm:$0xff]   ;;  %v1665_v10 = vld [vmem:[%s2114_s1] sm:$0xff]   ;;  %s1720_s10 = sshll.u32 %s1795_s9, 4  ;;  %s1721_s10 = int_to_ptr.vmem [resolvable:$false] %s1720_s10 }
  0x17   : > { %676 = vmatprep.subr.bf16.mxu0 %v1794_v1  ;;  %1581 = vmatprep.subr.bf16.mxu1 %v1794_v1  ;;  %v1670_v5 = vld [vmem:[%s1891_s13 + $0x4] ss:$8 sps:$4 sm:$0xff]   ;;  %v1666_v11 = vld [vmem:[%s2114_s1 + $0x48] ss:$0 sps:$4 sm:$0xff]   ;;  %v1674_v16 = vld [vmem:[%s1891_s13 + $0x14] ss:$8 sps:$4 sm:$0xff]  }
  0x18   : > { %1396 = vmatprep.mubr.msk.bf16.mxu0 %vm621_vm0, %v1670_v5  ;;  %v1673_v6 = vld [vmem:[%s1891_s13 + $0x84] ss:$8 sps:$4 sm:$0xff]   ;;  %v672_v12 = vsel %vm670_vm1, %v1666_v11, 0  ;;  %v1668_v14 = vld [vmem:[%s1891_s13] ss:$8 sps:$4 sm:$0xff]   ;;  %s1722_s11 = scalar_lea.vmem %s1721_s10, 4096 }
  0x19   : > { %1404 = vmatprep.mubr.msk.bf16.mxu1 %vm621_vm0, %v1673_v6  ;;  %v1667_v13 = vld [vmem:[%s2114_s1 + $0x40] sm:$0xff]   ;;  %v1676_v17 = vld [vmem:[%s1891_s13 + $0x94] ss:$8 sps:$4 sm:$0xff]   ;;  %v1678_v18 = vld [vmem:[%s1891_s13 + $0x10] ss:$8 sps:$4 sm:$0xff]  }
  0x1a   : > { %677 = vmatpush1.bf16.msra.mxu0 %v1659_v2  ;;  %1591 = vmatpush1.bf16.msra.mxu1 %v1659_v2  ;;  %v1671_v15 = vld [vmem:[%s1891_s13 + $0x80] ss:$8 sps:$4 sm:$0xff]   ;;  %v1679_v19 = vld [vmem:[%s1891_s13 + $0x90] ss:$8 sps:$4 sm:$0xff]   ;;  %v1680_v20 = vld [vmem:[%s1891_s13 + $0x24] ss:$8 sps:$4 sm:$0xff]  }
  0x1b   : > { %678 = vmatprep.subr.bf16.mxu0 %v1794_v1  ;;  %1582 = vmatprep.subr.bf16.mxu1 %v1794_v1  ;;  %v1682_v21 = vld [vmem:[%s1891_s13 + $0xa4] ss:$8 sps:$4 sm:$0xff]   ;;  %v1684_v22 = vld [vmem:[%s1891_s13 + $0x20] ss:$8 sps:$4 sm:$0xff]   ;;  %v1686_v24 = vld [vmem:[%s1891_s13 + $0x34] ss:$8 sps:$4 sm:$0xff]  }
  0x1c   : > { %v1685_v23 = vld [vmem:[%s1891_s13 + $0xa0] ss:$8 sps:$4 sm:$0xff]   ;;  %v1688_v25 = vld [vmem:[%s1891_s13 + $0xb4] ss:$8 sps:$4 sm:$0xff]   ;;  %v1690_v26 = vld [vmem:[%s1891_s13 + $0x30] ss:$8 sps:$4 sm:$0xff]  }
  0x1d   : > { %v1691_v27 = vld [vmem:[%s1891_s13 + $0xb0] ss:$8 sps:$4 sm:$0xff]   ;;  %v1692_v28 = vld [vmem:[%s1891_s13 + $0x44] ss:$8 sps:$4 sm:$0xff]   ;;  %v1696_v30 = vld [vmem:[%s1891_s13 + $0x40] ss:$8 sps:$4 sm:$0xff]  }
  0x1e   : > { %679 = vmatpush1.bf16.msra.mxu0 %v1660_v3  ;;  %1592 = vmatpush1.bf16.msra.mxu1 %v1660_v3  ;;  %v1694_v29 = vld [vmem:[%s1891_s13 + $0xc4] ss:$8 sps:$4 sm:$0xff]   ;;  %v1697_v31 = vld [vmem:[%s1891_s13 + $0xc0] ss:$8 sps:$4 sm:$0xff]   ;;  %v1698_v32 = vld [vmem:[%s1891_s13 + $0x54] ss:$8 sps:$4 sm:$0xff]  }
  0x1f   : > { %680 = vmatprep.subr.bf16.mxu0 %v1794_v1  ;;  %1583 = vmatprep.subr.bf16.mxu1 %v1794_v1  ;;  %v1700_v33 = vld [vmem:[%s1891_s13 + $0xd4] ss:$8 sps:$4 sm:$0xff]   ;;  %v1702_v34 = vld [vmem:[%s1891_s13 + $0x50] ss:$8 sps:$4 sm:$0xff]   ;;  %v1704_v36 = vld [vmem:[%s1891_s13 + $0x64] ss:$8 sps:$4 sm:$0xff]  }
  0x20   : > { %v1703_v35 = vld [vmem:[%s1891_s13 + $0xd0] ss:$8 sps:$4 sm:$0xff]   ;;  %v1706_v37 = vld [vmem:[%s1891_s13 + $0xe4] ss:$8 sps:$4 sm:$0xff]   ;;  %v1708_v38 = vld [vmem:[%s1891_s13 + $0x60] ss:$8 sps:$4 sm:$0xff]  }
  0x21   : > { %v1709_v39 = vld [vmem:[%s1891_s13 + $0xe0] ss:$8 sps:$4 sm:$0xff]   ;;  %v1710_v40 = vld [vmem:[%s1891_s13 + $0x74] ss:$8 sps:$4 sm:$0xff]   ;;  %v1714_v42 = vld [vmem:[%s1891_s13 + $0x70] ss:$8 sps:$4 sm:$0xff]  }
  0x22   : > { %681 = vmatpush1.bf16.msra.mxu0 %v1661_v4  ;;  %1593 = vmatpush1.bf16.msra.mxu1 %v1661_v4  ;;  %v1712_v41 = vld [vmem:[%s1891_s13 + $0xf4] ss:$8 sps:$4 sm:$0xff]   ;;  %v1715_v43 = vld [vmem:[%s1891_s13 + $0xf0] ss:$8 sps:$4 sm:$0xff]   ;;  %v1965_v44 = vld [vmem:[%s2115_s2] ss:$0 sm:$0xff] }
  0x23   : > { %682 = vmatprep.subr.bf16.mxu0 %v1794_v1  ;;  %1584 = vmatprep.subr.bf16.mxu1 %v1794_v1  ;;  %v1971_v48 = vld [vmem:[%s2116_s3] ss:$0 sm:$0xff]  ;;  %s269_s13 = sand.u32 1, %s1776_s16  }
  0x24   : > { %s1350_s24 = sshll.u32 %s269_s13, 7  ;;  %s2068_s18 = scalar_lea.sflag [#allocation4], %s269_s13 }
  0x25   : > { %s1987_s26 = scalar_lea.vmem [#allocation3], %s1350_s24 }
  0x26   : > { %683 = vmatpush1.bf16.msra.mxu0 %v1662_v7  ;;  %1594 = vmatpush1.bf16.msra.mxu1 %v1662_v7  ;;  %s1219_s30 = sshll.u32 %s1987_s26, 4  ;;  %s2062_s30 = int_to_ptr.vmem [resolvable:$true] %s1219_s30 }
  0x27   : > { %684 = vmatprep.subr.bf16.mxu0 %v1794_v1  ;;  %1585 = vmatprep.subr.bf16.mxu1 %v1794_v1  ;;  %s1716_s8 = scalar_lea.vmem %s2062_s30, 2048  ;;  %p1723_p1 = scmp.lt.s32.totalorder %s2062_s30, %s1721_s10 }
  0x28   : > { %p1717_p12 = scmp.ne.s32.totalorder %s2062_s30, %s1716_s8  ;;  %p1724_p2 = scmp.lt.s32.totalorder %s1722_s11, %s1716_s8 }
  0x2a   : > { %685 = vmatpush1.bf16.msra.mxu0 %v1663_v8  ;;  %1595 = vmatpush1.bf16.msra.mxu1 %v1663_v8  ;;  %p1718_p13 = pnand %p1717_p12, %p1863_p4  ;;  %p1725_p3 = por %p1724_p2, %p1723_p1 }
  0x2b   : > { %686 = vmatprep.subr.bf16.mxu0 %v1794_v1  ;;  %1586 = vmatprep.subr.bf16.mxu1 %v1794_v1 }
  0x2c   : > { %p1719_p0 = pneg %p1718_p13 }
  0x2e   : > { %687 = vmatpush1.bf16.msra.mxu0 %v1664_v9  ;;  %1596 = vmatpush1.bf16.msra.mxu1 %v1664_v9  ;;  %p1726_p5 = pnand %p1725_p3, %p1719_p0 }
  0x2f   : > { %688 = vmatprep.subr.bf16.mxu0 %v1794_v1  ;;  %1587 = vmatprep.subr.bf16.mxu1 %v1794_v1 }
  0x32   : > { %689 = vmatpush1.bf16.msra.mxu0 %v1665_v10  ;;  %1597 = vmatpush1.bf16.msra.mxu1 %v1665_v10 }
  0x33   : > { %702 = vmatprep.subr.bf16.mxu0 %v1794_v1  ;;  %1588 = vmatprep.subr.bf16.mxu1 %v1794_v1 }
  0x36   : > { %703 = vmatpush2.bf16.msra.mxu0 %v672_v12  ;;  %1598 = vmatpush2.bf16.msra.mxu1 %v672_v12 }
  0x37   : > { %704 = vmatprep.subr.bf16.mxu0 %v1794_v1  ;;  %1589 = vmatprep.subr.bf16.mxu1 %v1794_v1 }
  0x3a   : > { %705 = vmatpush2.bf16.msra.mxu0 %v1667_v13  ;;  %1599 = vmatpush2.bf16.msra.mxu1 %v1667_v13 }
  0x3d   : > { %707 = vmatmul.mubr.bf16.vlgmr.msra.gmra.mxu0 %v1668_v14  ;;  %771 = vmatmul.mubr.bf16.vlgmr.msra.gmra.mxu1 %v1671_v15 }
  0x3e   : > { %1397 = vmatprep.mubr.msk.bf16.mxu0 %vm621_vm0, %v1674_v16  ;;  %1405 = vmatprep.mubr.msk.bf16.mxu1 %vm621_vm0, %v1676_v17 }
  0x45   : > { %715 = vmatmul.mubr.bf16.gmra.mxu0 %v1678_v18  ;;  %779 = vmatmul.mubr.bf16.gmra.mxu1 %v1679_v19 }
  0x46   : > { %1398 = vmatprep.mubr.msk.bf16.mxu0 %vm621_vm0, %v1680_v20  ;;  %1406 = vmatprep.mubr.msk.bf16.mxu1 %vm621_vm0, %v1682_v21 }
  0x4d   : > { %723 = vmatmul.mubr.bf16.gmra.mxu0 %v1684_v22  ;;  %787 = vmatmul.mubr.bf16.gmra.mxu1 %v1685_v23 }
  0x4e   : > { %1399 = vmatprep.mubr.msk.bf16.mxu0 %vm621_vm0, %v1686_v24  ;;  %1407 = vmatprep.mubr.msk.bf16.mxu1 %vm621_vm0, %v1688_v25 }
  0x55   : > { %731 = vmatmul.mubr.bf16.gmra.mxu0 %v1690_v26  ;;  %795 = vmatmul.mubr.bf16.gmra.mxu1 %v1691_v27 }
  0x56   : > { %1400 = vmatprep.mubr.msk.bf16.mxu0 %vm621_vm0, %v1692_v28  ;;  %1408 = vmatprep.mubr.msk.bf16.mxu1 %vm621_vm0, %v1694_v29 }
  0x5d   : > { %739 = vmatmul.mubr.bf16.gmra.mxu0 %v1696_v30  ;;  %803 = vmatmul.mubr.bf16.gmra.mxu1 %v1697_v31 }
  0x5e   : > { %1401 = vmatprep.mubr.msk.bf16.mxu0 %vm621_vm0, %v1698_v32  ;;  %1409 = vmatprep.mubr.msk.bf16.mxu1 %vm621_vm0, %v1700_v33 }
  0x65   : > { %747 = vmatmul.mubr.bf16.gmra.mxu0 %v1702_v34  ;;  %811 = vmatmul.mubr.bf16.gmra.mxu1 %v1703_v35 }
  0x66   : > { %1402 = vmatprep.mubr.msk.bf16.mxu0 %vm621_vm0, %v1704_v36  ;;  %1410 = vmatprep.mubr.msk.bf16.mxu1 %vm621_vm0, %v1706_v37 }
  0x6d   : > { %755 = vmatmul.mubr.bf16.gmra.mxu0 %v1708_v38  ;;  %819 = vmatmul.mubr.bf16.gmra.mxu1 %v1709_v39 }
  0x6e   : > { %1403 = vmatprep.mubr.msk.bf16.mxu0 %vm621_vm0, %v1710_v40  ;;  %1411 = vmatprep.mubr.msk.bf16.mxu1 %vm621_vm0, %v1712_v41 }
  0x75   : > { %763 = vmatmul.mubr.bf16.gmra.mxu0 %v1714_v42  ;;  %827 = vmatmul.mubr.bf16.gmra.mxu1 %v1715_v43 }
  0xfd   : > { %v708_v45 = vpop.f32.mrf.mxu0  ;;  %v772_v46 = vpop.f32.mrf.mxu1 }
  0xfe   : > { %v941_v47 = vmul.f32 %v1965_v44, %v708_v45  ;;  %v957_v49 = vmul.f32 %v1965_v44, %v772_v46 }
  0xff   : > { %v710_v50 = vpop.f32.mrf.mxu0  ;;  %v774_v51 = vpop.f32.mrf.mxu1 }
 0x100   : > { %v980_v52 = vadd.f32 %v1971_v48, %v941_v47  ;;  %v996_v53 = vadd.f32 %v1971_v48, %v957_v49 }
 0x101   : > { %v711_v54 = vpop.f32.mrf.mxu0  ;;  %v775_v55 = vpop.f32.mrf.mxu1 }
 0x102   : > { %v942_v56 = vmul.f32 %v1965_v44, %v711_v54  ;;  %v958_v57 = vmul.f32 %v1965_v44, %v775_v55  ;;  %v1012_v62 = vmax.f32 %v980_v52, 0.0  ;;  %v1028_v63 = vmax.f32 %v996_v53, 0.0 }
 0x103   : > { %v713_v58 = vpop.f32.mrf.mxu0  ;;  %v777_v59 = vpop.f32.mrf.mxu1 }
 0x104   : > { %v981_v60 = vadd.f32 %v1971_v48, %v942_v56  ;;  %v997_v61 = vadd.f32 %v1971_v48, %v958_v57 }
 0x105   : > { %v716_v0 = vpop.f32.mrf.mxu0  ;;  %v780_v1 = vpop.f32.mrf.mxu1 }
 0x106   : > { %v1013_v2 = vmax.f32 %v981_v60, 0.0  ;;  %v1029_v3 = vmax.f32 %v997_v61, 0.0  ;;  %v943_v4 = vmul.f32 %v1965_v44, %v716_v0  ;;  %v959_v5 = vmul.f32 %v1965_v44, %v780_v1 }
 0x107   : > { %v718_v6 = vpop.f32.mrf.mxu0  ;;  %v782_v7 = vpop.f32.mrf.mxu1 }
 0x108   : > { %v1488_v8 = vpack.c.bf16 %v1013_v2, %v1012_v62  ;;  %v1528_v9 = vpack.c.bf16 %v1029_v3, %v1028_v63  ;;  %v982_v10 = vadd.f32 %v1971_v48, %v943_v4  ;;  %v998_v11 = vadd.f32 %v1971_v48, %v959_v5 }
 0x109   : > { %v719_v12 = vpop.f32.mrf.mxu0  ;;  %v783_v13 = vpop.f32.mrf.mxu1 }
 0x10a   : > { %1489 = vst [vmem:[%s1987_s26] sm:$0xff] %v1488_v8   ;;  %1572 = vst [vmem:[%s1987_s26 + $0x40] sm:$0xff] %v1528_v9   ;;  %v944_v14 = vmul.f32 %v1965_v44, %v719_v12  ;;  %v960_v15 = vmul.f32 %v1965_v44, %v783_v13  ;;  %v1014_v20 = vmax.f32 %v982_v10, 0.0  ;;  %v1030_v21 = vmax.f32 %v998_v11, 0.0 }
 0x10b   : > { %v721_v16 = vpop.f32.mrf.mxu0  ;;  %v785_v17 = vpop.f32.mrf.mxu1 }
 0x10c   : > { %v983_v18 = vadd.f32 %v1971_v48, %v944_v14  ;;  %v999_v19 = vadd.f32 %v1971_v48, %v960_v15 }
 0x10d   : > { %v724_v22 = vpop.f32.mrf.mxu0  ;;  %v788_v23 = vpop.f32.mrf.mxu1 }
 0x10e   : > { %v1015_v24 = vmax.f32 %v983_v18, 0.0  ;;  %v1031_v25 = vmax.f32 %v999_v19, 0.0  ;;  %v945_v26 = vmul.f32 %v1965_v44, %v724_v22  ;;  %v961_v27 = vmul.f32 %v1965_v44, %v788_v23 }
 0x10f   : > { %v726_v28 = vpop.f32.mrf.mxu0  ;;  %v790_v29 = vpop.f32.mrf.mxu1 }
 0x110   : > { %v1493_v30 = vpack.c.bf16 %v1015_v24, %v1014_v20  ;;  %v1533_v31 = vpack.c.bf16 %v1031_v25, %v1030_v21  ;;  %v984_v32 = vadd.f32 %v1971_v48, %v945_v26  ;;  %v1000_v33 = vadd.f32 %v1971_v48, %v961_v27 }
 0x111   : > { %v727_v34 = vpop.f32.mrf.mxu0  ;;  %v791_v35 = vpop.f32.mrf.mxu1 }
 0x112   : > { %1565 = vst [vmem:[%s1987_s26 + $0x8] sm:$0xff] %v1493_v30   ;;  %1573 = vst [vmem:[%s1987_s26 + $0x48] sm:$0xff] %v1533_v31   ;;  %v946_v36 = vmul.f32 %v1965_v44, %v727_v34  ;;  %v962_v37 = vmul.f32 %v1965_v44, %v791_v35  ;;  %v1016_v42 = vmax.f32 %v984_v32, 0.0  ;;  %v1032_v43 = vmax.f32 %v1000_v33, 0.0 }
 0x113   : > { %v729_v38 = vpop.f32.mrf.mxu0  ;;  %v793_v39 = vpop.f32.mrf.mxu1 }
 0x114   : > { %v985_v40 = vadd.f32 %v1971_v48, %v946_v36  ;;  %v1001_v41 = vadd.f32 %v1971_v48, %v962_v37 }
 0x115   : > { %v732_v45 = vpop.f32.mrf.mxu0  ;;  %v796_v46 = vpop.f32.mrf.mxu1 }
 0x116   : > { %v1017_v47 = vmax.f32 %v985_v40, 0.0  ;;  %v1033_v49 = vmax.f32 %v1001_v41, 0.0  ;;  %v947_v50 = vmul.f32 %v1965_v44, %v732_v45  ;;  %v963_v51 = vmul.f32 %v1965_v44, %v796_v46 }
 0x117   : > { %v734_v52 = vpop.f32.mrf.mxu0  ;;  %v798_v53 = vpop.f32.mrf.mxu1 }
 0x118   : > { %v1498_v54 = vpack.c.bf16 %v1017_v47, %v1016_v42  ;;  %v1538_v55 = vpack.c.bf16 %v1033_v49, %v1032_v43  ;;  %v986_v56 = vadd.f32 %v1971_v48, %v947_v50  ;;  %v1002_v57 = vadd.f32 %v1971_v48, %v963_v51 }
 0x119   : > { %v735_v58 = vpop.f32.mrf.mxu0  ;;  %v799_v59 = vpop.f32.mrf.mxu1 }
 0x11a   : > { %1566 = vst [vmem:[%s1987_s26 + $0x10] sm:$0xff] %v1498_v54   ;;  %1574 = vst [vmem:[%s1987_s26 + $0x50] sm:$0xff] %v1538_v55   ;;  %v948_v60 = vmul.f32 %v1965_v44, %v735_v58  ;;  %v964_v61 = vmul.f32 %v1965_v44, %v799_v59  ;;  %v1018_v2 = vmax.f32 %v986_v56, 0.0  ;;  %v1034_v3 = vmax.f32 %v1002_v57, 0.0 }
 0x11b   : > { %v737_v62 = vpop.f32.mrf.mxu0  ;;  %v801_v63 = vpop.f32.mrf.mxu1 }
 0x11c   : > { %v987_v0 = vadd.f32 %v1971_v48, %v948_v60  ;;  %v1003_v1 = vadd.f32 %v1971_v48, %v964_v61 }
 0x11d   : > { %v740_v4 = vpop.f32.mrf.mxu0  ;;  %v804_v5 = vpop.f32.mrf.mxu1 }
 0x11e   : > { %v1019_v6 = vmax.f32 %v987_v0, 0.0  ;;  %v1035_v7 = vmax.f32 %v1003_v1, 0.0  ;;  %v949_v8 = vmul.f32 %v1965_v44, %v740_v4  ;;  %v965_v9 = vmul.f32 %v1965_v44, %v804_v5 }
 0x11f   : > { %v742_v10 = vpop.f32.mrf.mxu0  ;;  %v806_v11 = vpop.f32.mrf.mxu1 }
 0x120   : > { %v1503_v12 = vpack.c.bf16 %v1019_v6, %v1018_v2  ;;  %v1543_v13 = vpack.c.bf16 %v1035_v7, %v1034_v3  ;;  %v988_v14 = vadd.f32 %v1971_v48, %v949_v8  ;;  %v1004_v15 = vadd.f32 %v1971_v48, %v965_v9 }
 0x121   : > { %v743_v16 = vpop.f32.mrf.mxu0  ;;  %v807_v17 = vpop.f32.mrf.mxu1 }
 0x122   : > { %1567 = vst [vmem:[%s1987_s26 + $0x18] sm:$0xff] %v1503_v12   ;;  %1575 = vst [vmem:[%s1987_s26 + $0x58] sm:$0xff] %v1543_v13   ;;  %v950_v18 = vmul.f32 %v1965_v44, %v743_v16  ;;  %v966_v19 = vmul.f32 %v1965_v44, %v807_v17  ;;  %v1020_v24 = vmax.f32 %v988_v14, 0.0  ;;  %v1036_v25 = vmax.f32 %v1004_v15, 0.0 }
 0x123   : > { %v745_v20 = vpop.f32.mrf.mxu0  ;;  %v809_v21 = vpop.f32.mrf.mxu1 }
 0x124   : > { %v989_v22 = vadd.f32 %v1971_v48, %v950_v18  ;;  %v1005_v23 = vadd.f32 %v1971_v48, %v966_v19 }
 0x125   : > { %v748_v26 = vpop.f32.mrf.mxu0  ;;  %v812_v27 = vpop.f32.mrf.mxu1 }
 0x126   : > { %v1021_v28 = vmax.f32 %v989_v22, 0.0  ;;  %v1037_v29 = vmax.f32 %v1005_v23, 0.0  ;;  %v951_v30 = vmul.f32 %v1965_v44, %v748_v26  ;;  %v967_v31 = vmul.f32 %v1965_v44, %v812_v27 }
 0x127   : > { %v750_v32 = vpop.f32.mrf.mxu0  ;;  %v814_v33 = vpop.f32.mrf.mxu1 }
 0x128   : > { %v1508_v34 = vpack.c.bf16 %v1021_v28, %v1020_v24  ;;  %v1548_v35 = vpack.c.bf16 %v1037_v29, %v1036_v25  ;;  %v990_v36 = vadd.f32 %v1971_v48, %v951_v30  ;;  %v1006_v37 = vadd.f32 %v1971_v48, %v967_v31 }
 0x129   : > { %v751_v38 = vpop.f32.mrf.mxu0  ;;  %v815_v39 = vpop.f32.mrf.mxu1 }
 0x12a   : > { %1568 = vst [vmem:[%s1987_s26 + $0x20] sm:$0xff] %v1508_v34   ;;  %1576 = vst [vmem:[%s1987_s26 + $0x60] sm:$0xff] %v1548_v35   ;;  %v952_v40 = vmul.f32 %v1965_v44, %v751_v38  ;;  %v968_v41 = vmul.f32 %v1965_v44, %v815_v39  ;;  %v1022_v47 = vmax.f32 %v990_v36, 0.0  ;;  %v1038_v49 = vmax.f32 %v1006_v37, 0.0 }
 0x12b   : > { %v753_v42 = vpop.f32.mrf.mxu0  ;;  %v817_v43 = vpop.f32.mrf.mxu1 }
 0x12c   : > { %v991_v45 = vadd.f32 %v1971_v48, %v952_v40  ;;  %v1007_v46 = vadd.f32 %v1971_v48, %v968_v41 }
 0x12d   : > { %v756_v50 = vpop.f32.mrf.mxu0  ;;  %v820_v51 = vpop.f32.mrf.mxu1 }
 0x12e   : > { %v1023_v52 = vmax.f32 %v991_v45, 0.0  ;;  %v1039_v53 = vmax.f32 %v1007_v46, 0.0  ;;  %v953_v54 = vmul.f32 %v1965_v44, %v756_v50  ;;  %v969_v55 = vmul.f32 %v1965_v44, %v820_v51 }
 0x12f   : > { %v758_v56 = vpop.f32.mrf.mxu0  ;;  %v822_v57 = vpop.f32.mrf.mxu1 }
 0x130   : > { %v1513_v58 = vpack.c.bf16 %v1023_v52, %v1022_v47  ;;  %v1553_v59 = vpack.c.bf16 %v1039_v53, %v1038_v49  ;;  %v992_v60 = vadd.f32 %v1971_v48, %v953_v54  ;;  %v1008_v61 = vadd.f32 %v1971_v48, %v969_v55 }
 0x131   : > { %v759_v62 = vpop.f32.mrf.mxu0  ;;  %v823_v63 = vpop.f32.mrf.mxu1 }
 0x132   : > { %1569 = vst [vmem:[%s1987_s26 + $0x28] sm:$0xff] %v1513_v58   ;;  %1577 = vst [vmem:[%s1987_s26 + $0x68] sm:$0xff] %v1553_v59   ;;  %v954_v0 = vmul.f32 %v1965_v44, %v759_v62  ;;  %v970_v1 = vmul.f32 %v1965_v44, %v823_v63  ;;  %v1024_v6 = vmax.f32 %v992_v60, 0.0  ;;  %v1040_v7 = vmax.f32 %v1008_v61, 0.0 }
 0x133   : > { %v761_v2 = vpop.f32.mrf.mxu0  ;;  %v825_v3 = vpop.f32.mrf.mxu1 }
 0x134   : > { %v993_v4 = vadd.f32 %v1971_v48, %v954_v0  ;;  %v1009_v5 = vadd.f32 %v1971_v48, %v970_v1 }
 0x135   : > { %v764_v8 = vpop.f32.mrf.mxu0  ;;  %v828_v9 = vpop.f32.mrf.mxu1 }
 0x136   : > { %v1025_v10 = vmax.f32 %v993_v4, 0.0  ;;  %v1041_v11 = vmax.f32 %v1009_v5, 0.0  ;;  %v955_v12 = vmul.f32 %v1965_v44, %v764_v8  ;;  %v971_v13 = vmul.f32 %v1965_v44, %v828_v9 }
 0x137   : > { %v766_v14 = vpop.f32.mrf.mxu0  ;;  %v830_v15 = vpop.f32.mrf.mxu1 }
 0x138   : > { %v1518_v16 = vpack.c.bf16 %v1025_v10, %v1024_v6  ;;  %v1558_v17 = vpack.c.bf16 %v1041_v11, %v1040_v7  ;;  %v994_v20 = vadd.f32 %v1971_v48, %v955_v12  ;;  %v1010_v21 = vadd.f32 %v1971_v48, %v971_v13 }
 0x139   : > { %v767_v18 = vpop.f32.mrf.mxu0  ;;  %v831_v19 = vpop.f32.mrf.mxu1 }
 0x13a   : > { %1570 = vst [vmem:[%s1987_s26 + $0x30] sm:$0xff] %v1518_v16   ;;  %1578 = vst [vmem:[%s1987_s26 + $0x70] sm:$0xff] %v1558_v17   ;;  %v956_v22 = vmul.f32 %v1965_v44, %v767_v18  ;;  %v972_v23 = vmul.f32 %v1965_v44, %v831_v19  ;;  %v1026_v28 = vmax.f32 %v994_v20, 0.0  ;;  %v1042_v29 = vmax.f32 %v1010_v21, 0.0 }
 0x13b   : > { %v769_v24 = vpop.f32.mrf.mxu0  ;;  %v833_v25 = vpop.f32.mrf.mxu1 }
 0x13c   : > { %v995_v26 = vadd.f32 %v1971_v48, %v956_v22  ;;  %v1011_v27 = vadd.f32 %v1971_v48, %v972_v23 }
 0x13e   : > { %v1027_v30 = vmax.f32 %v995_v26, 0.0  ;;  %v1043_v31 = vmax.f32 %v1011_v27, 0.0 }
 0x140   : > { %v1523_v44 = vpack.c.bf16 %v1027_v30, %v1026_v28  ;;  %v1563_v32 = vpack.c.bf16 %v1043_v31, %v1042_v29 }
 0x142   : > { %1571 = vst [vmem:[%s1987_s26 + $0x38] sm:$0xff] %v1523_v44   ;;  %1579 = vst [vmem:[%s1987_s26 + $0x78] sm:$0xff] %v1563_v32  }
 0x143   : > { %1729 = shalt.err (!%p1726_p5)
}
 0x144   : > { %s1730_s12 = scalar_lea.hbm %s2060_s7, 2048  ;;  %s1734_s22 = scalar_lea.hbm %s2117_s4, 16384 }
 0x145   : > { %p1731_p6 = scmp.ne.s32.totalorder %s2060_s7, %s1730_s12  ;;  %p1735_p10 = scmp.lt.s32.totalorder %s2060_s7, %s2117_s4 }
 0x146   : > { %p1736_p11 = scmp.lt.s32.totalorder %s1734_s22, %s1730_s12 }
 0x147   : > { %p1732_p7 = pnand %p1731_p6, %p1863_p4 }
 0x148   : > { %p1737_p12 = por %p1736_p11, %p1735_p10 }
 0x149   : > { %p1733_p9 = pneg %p1732_p7 }
 0x14b   : > { %p1738_p13 = pnand %p1737_p12, %p1733_p9 }
 0x14d   : > { %1741 = shalt.err (!%p1738_p13)
}
 0x14e   : > { %s1796_s26 = smov 64   ;;  %s1797_s29 = smov 4  }
 0x14f   : > { %1600 = dma.vmem_to_hbm [thread:$0]  (%p1863_p4), %s2062_s30, 2048, %s2060_s7, %s2068_s18, %s1796_s26, %s1796_s26, %s1797_s29  }
 0x150 PF: > { %p1606_p0 = scmp.ge.s32.totalorder %s1792_s20, 2  ;;  %s1234_s5 = sand.u32 1, %s1772_s15  }
 0x151   : > { %s1235_s6 = scalar_lea.sflag [#allocation4], %s1234_s5 }
 0x152   : > { %p1603_p1 = pnand %p1606_p0, %p1870_p8 }
 0x154   : > { %p1604_p2 = pneg %p1603_p1 }
 0x156   : > { %1767 = dma.done.wait (%p1604_p2), %s1235_s6, 2048  }
 0x157   : > { %1769 = vsyncadd (%p1604_p2), %s1235_s6, 4294965248  ;;  %s17_s20 = sadd.s32 1, %s1792_s20   ;;  %s2120_s15 = smov %s1776_s16 }
 0x158   : > { %p14_p3 = scmp.ge.s32.totalorder %s17_s20, 10   ;;  %s2121_s16 = smov %s1780_s17 }
 0x159   : > { %s2122_s17 = smov %s1876_s28  ;;  %s2123_s18 = smov %s1788_s19 }
 0x15a   : > { %s2124_s19 = smov %s2126_s23  ;;  %16 = sbr.rel (!%p14_p3) target bundleno = 4 (0x4), region = 88 }
 0x15f   :  { %1240 = vsyncpa [#allocation4], 1 }
 0x160   :  { %1242 = vsyncpa [#allocation4 + $0x1], 1 }

</bundles_post_ra>
